<compile_context>
chip_gen: v6e
topology: v6e:2x2x1
jax: 0.10.0
libtpu: 0.0.40
codegen_flags: <defaults>
</compile_context>

<pallas_src>
import functools

import jax
import jax.numpy as jnp
from jax.experimental import pallas as pl
from jax.experimental.pallas import tpu as pltpu


def downsampling_kernel(x_ref, w_ref, gb_ref, o_ref, *, T, K, P, eps, neg_slope):
    """Fused Conv1d + BatchNorm1d (batch stats) + LeakyReLU.

    x_ref  : (C_in, N*T)      input; time fused with batch on the lane axis
    w_ref  : (C_out, K*C_in)  im2col conv weight, rows ordered (k, c_in)
    gb_ref : (2, C_out, 1)    stacked [gamma; beta]
    o_ref  : (C_out, N*T)
    """
    NT = x_ref.shape[1]
    x2 = x_ref[...]                                        # (C_in, NT)

    # Position of each column inside its length-T batch segment (for halo masking).
    t_in = jax.lax.broadcasted_iota(jnp.int32, (1, NT), 1) % T

    # Build the im2col slab: row (k*C_in + ci) = x shifted by (k - P) along time,
    # zero outside each batch segment.  pltpu.roll is an XLU rotate (cheap slot);
    # wrap-around across segments never reaches a valid (unmasked) column.
    parts = []
    for k in range(K):                                     # static, small (K=15)
        d = k - P                                          # signed tap offset
        if d == 0:
            parts.append(x2)
            continue
        rolled = pltpu.roll(x2, shift=(-d) % NT, axis=1)   # rolled[:, j] = x2[:, j + d]
        valid = (t_in >= -d) if d < 0 else (t_in < T - d)
        parts.append(jnp.where(valid, rolled, 0.0))
    slab = jnp.concatenate(parts, axis=0)                  # (K*C_in, NT)

    # Conv1d as a single MXU matmul (contraction = K*C_in, columns = N*T).
    y = jnp.dot(w_ref[...], slab, preferred_element_type=jnp.float32)   # (C_out, NT)

    # BatchNorm1d, training mode: biased batch stats over the fused (N, T) axis.
    # (Conv bias omitted on purpose: it cancels exactly in y - mean.)
    mean = jnp.mean(y, axis=-1, keepdims=True)             # (C_out, 1)
    centered = y - mean
    var = jnp.mean(centered * centered, axis=-1, keepdims=True)
    inv = jax.lax.rsqrt(var + eps)

    gamma = gb_ref[0]                                      # (C_out, 1)
    beta = gb_ref[1]
    z = centered * (inv * gamma) + beta

    # LeakyReLU(negative_slope=0.1)
    o_ref[...] = jnp.where(z >= 0, z, neg_slope * z)


def downsampling_layer(x, w, b, gamma, beta, *, padding=7, eps=1e-5, neg_slope=0.1):
    """x: (N, C_in, T) f32; w: (C_out, C_in, K); b/gamma/beta: (C_out,).

    Returns (N, C_out, T) = LeakyReLU(BatchNorm1d_train(Conv1d(x))).
    """
    del b  # conv bias is a no-op before training-mode BatchNorm (cancels in y - mean)
    N, C_in, T = x.shape
    C_out, _, K = w.shape
    NT = N * T

    # Lane-dense layout plumbing (XLA side, tiny): fuse batch into the time/lane axis.
    x2 = jnp.transpose(x, (1, 0, 2)).reshape(C_in, NT)           # (C_in, N*T)
    w2 = jnp.transpose(w, (0, 2, 1)).reshape(C_out, K * C_in)    # rows ordered (k, c_in)
    gb = jnp.stack([gamma, beta], axis=0).reshape(2, C_out, 1)

    kernel = functools.partial(downsampling_kernel, T=T, K=K, P=padding,
                               eps=eps, neg_slope=neg_slope)

    # Single-shot kernel: the whole problem fits comfortably in VMEM at these sizes.
    # TODO(synk): for production-size T/C, tile T (multiples of 128, K-1 halo) with a
    # two-pass BN (partial sum/sumsq then normalize) so it pipelines, fits v7x's 64 MiB
    # VMEM, and can use a "parallel" grid axis across both v7x TensorCores.
    out2 = pl.pallas_call(
        kernel,
        out_shape=jax.ShapeDtypeStruct((C_out, NT), jnp.float32),
        grid=(1,),
        in_specs=[
            pl.BlockSpec((C_in, NT), lambda i: (0, 0)),
            pl.BlockSpec((C_out, K * C_in), lambda i: (0, 0)),
            pl.BlockSpec((2, C_out, 1), lambda i: (0, 0, 0)),
        ],
        out_specs=pl.BlockSpec((C_out, NT), lambda i: (0, 0)),
        compiler_params=pltpu.CompilerParams(
            dimension_semantics=("arbitrary",)),
    )(x2, w2, gb)

    # (C_out, N*T) -> (N, C_out, T)
    return jnp.transpose(out2.reshape(C_out, N, T), (1, 0, 2))


def reference(x, w, b, gamma, beta, *, padding=7, eps=1e-5, neg_slope=0.1):
    """Pure-JAX reference mirroring torch: Conv1d(+bias) -> BatchNorm1d(train) -> LeakyReLU."""
    y = jax.lax.conv_general_dilated(
        x, w, window_strides=(1,), padding=[(padding, padding)],
        dimension_numbers=("NCH", "OIH", "NCH"))
    y = y + b[None, :, None]
    mean = jnp.mean(y, axis=(0, 2), keepdims=True)
    var = jnp.mean((y - mean) ** 2, axis=(0, 2), keepdims=True)
    z = (y - mean) / jnp.sqrt(var + eps) * gamma[None, :, None] + beta[None, :, None]
    return jnp.where(z >= 0, z, neg_slope * z)


if __name__ == "__main__":
    # Small shapes consistent with the module: N=2, C_in=4, C_out=8, T=128, K=15.
    N, C_IN, C_OUT, T, K = 2, 4, 8, 128, 15
    key = jax.random.PRNGKey(0)
    kx, kw, kb, kg, kbeta = jax.random.split(key, 5)

    x = jax.random.normal(kx, (N, C_IN, T), dtype=jnp.float32)
    w = 0.1 * jax.random.normal(kw, (C_OUT, C_IN, K), dtype=jnp.float32)
    b = 0.05 * jax.random.normal(kb, (C_OUT,), dtype=jnp.float32)
    gamma = 1.0 + 0.1 * jax.random.normal(kg, (C_OUT,), dtype=jnp.float32)
    beta = 0.05 * jax.random.normal(kbeta, (C_OUT,), dtype=jnp.float32)

    out = downsampling_layer(x, w, b, gamma, beta)
    out = jax.block_until_ready(out)

    ref = reference(x, w, b, gamma, beta)
    assert out.shape == (N, C_OUT, T)
    assert jnp.allclose(out, ref, atol=1e-4, rtol=1e-4), (
        float(jnp.max(jnp.abs(out - ref))))

    print("KERNEL_OK")
</pallas_src>

<mosaic_0001>
module attributes {stable_mosaic.version = 11 : i64} {
  func.func @downsampling_kernel(%arg0: i32, %arg1: memref<4x256xf32, #tpu.memory_space<vmem>>, %arg2: memref<8x60xf32, #tpu.memory_space<vmem>>, %arg3: memref<2x8x1xf32, #tpu.memory_space<vmem>>, %arg4: memref<8x256xf32, #tpu.memory_space<vmem>>) attributes {dimension_semantics = [#tpu.dimension_semantics<arbitrary>], iteration_bounds = array<i64: 1>, scalar_prefetch = 0 : i64, scratch_operands = 0 : i64, tpu.core_type = #tpu.core_type<tc>, window_params = [{pipeline_mode = #tpu.pipeline_mode<synchronous>, transform_indices = @transform_0, window_bounds = array<i64: 4, 256>}, {pipeline_mode = #tpu.pipeline_mode<synchronous>, transform_indices = @transform_1, window_bounds = array<i64: 8, 60>}, {pipeline_mode = #tpu.pipeline_mode<synchronous>, transform_indices = @transform_2, window_bounds = array<i64: 2, 8, 1>}, {pipeline_mode = #tpu.pipeline_mode<synchronous>, transform_indices = @transform_3, window_bounds = array<i64: 8, 256>}]} {
    %c0 = arith.constant 0 : index
    %c0_0 = arith.constant 0 : index
    %0 = vector.load %arg1[%c0, %c0_0] : memref<4x256xf32, #tpu.memory_space<vmem>>, vector<4x256xf32>
    %1 = tpu.iota {dimensions = array<i32: 1>} : vector<1x256xi32>
    %c128_i32 = arith.constant 128 : i32
    %c0_i32 = arith.constant 0 : i32
    %2 = arith.cmpi eq, %c128_i32, %c0_i32 : i32
    %c1_i32 = arith.constant 1 : i32
    %3 = arith.select %2, %c1_i32, %c128_i32 : i32
    %4 = vector.broadcast %3 : i32 to vector<1x256xi32>
    %5 = arith.remsi %1, %4 : vector<1x256xi32>
    %c0_i32_1 = arith.constant 0 : i32
    %6 = vector.broadcast %c0_i32_1 : i32 to vector<1x256xi32>
    %7 = arith.cmpi ne, %5, %6 : vector<1x256xi32>
    %c0_i32_2 = arith.constant 0 : i32
    %8 = vector.broadcast %c0_i32_2 : i32 to vector<1x256xi32>
    %9 = arith.cmpi slt, %5, %8 : vector<1x256xi32>
    %c0_i32_3 = arith.constant 0 : i32
    %10 = arith.cmpi slt, %3, %c0_i32_3 : i32
    %11 = vector.broadcast %10 : i1 to vector<1x256xi1>
    %12 = vector.broadcast %11 : vector<1x256xi1> to vector<1x256xi1>
    %13 = arith.xori %9, %12 : vector<1x256xi1>
    %14 = arith.andi %13, %7 : vector<1x256xi1>
    %15 = vector.broadcast %3 : i32 to vector<1x256xi32>
    %16 = arith.addi %5, %15 : vector<1x256xi32>
    %17 = arith.select %14, %16, %5 : vector<1x256xi1>, vector<1x256xi32>
    %c7_i32 = arith.constant 7 : i32
    %18 = tpu.dynamic_rotate %0 by %c7_i32 dim 1 : vector<4x256xf32>, i32 -> vector<4x256xf32>
    %c7_i32_4 = arith.constant 7 : i32
    %19 = vector.broadcast %c7_i32_4 : i32 to vector<1x256xi32>
    %20 = arith.cmpi sge, %17, %19 : vector<1x256xi32>
    %cst = arith.constant 0.000000e+00 : f32
    %21 = vector.shape_cast %20 : vector<1x256xi1> to vector<1x256xi1>
    %22 = vector.broadcast %21 : vector<1x256xi1> to vector<4x256xi1>
    %23 = vector.broadcast %cst : f32 to vector<4x256xf32>
    %24 = arith.select %22, %18, %23 : vector<4x256xi1>, vector<4x256xf32>
    %c6_i32 = arith.constant 6 : i32
    %25 = tpu.dynamic_rotate %0 by %c6_i32 dim 1 : vector<4x256xf32>, i32 -> vector<4x256xf32>
    %c6_i32_5 = arith.constant 6 : i32
    %26 = vector.broadcast %c6_i32_5 : i32 to vector<1x256xi32>
    %27 = arith.cmpi sge, %17, %26 : vector<1x256xi32>
    %cst_6 = arith.constant 0.000000e+00 : f32
    %28 = vector.shape_cast %27 : vector<1x256xi1> to vector<1x256xi1>
    %29 = vector.broadcast %28 : vector<1x256xi1> to vector<4x256xi1>
    %30 = vector.broadcast %cst_6 : f32 to vector<4x256xf32>
    %31 = arith.select %29, %25, %30 : vector<4x256xi1>, vector<4x256xf32>
    %c5_i32 = arith.constant 5 : i32
    %32 = tpu.dynamic_rotate %0 by %c5_i32 dim 1 : vector<4x256xf32>, i32 -> vector<4x256xf32>
    %c5_i32_7 = arith.constant 5 : i32
    %33 = vector.broadcast %c5_i32_7 : i32 to vector<1x256xi32>
    %34 = arith.cmpi sge, %17, %33 : vector<1x256xi32>
    %cst_8 = arith.constant 0.000000e+00 : f32
    %35 = vector.shape_cast %34 : vector<1x256xi1> to vector<1x256xi1>
    %36 = vector.broadcast %35 : vector<1x256xi1> to vector<4x256xi1>
    %37 = vector.broadcast %cst_8 : f32 to vector<4x256xf32>
    %38 = arith.select %36, %32, %37 : vector<4x256xi1>, vector<4x256xf32>
    %c4_i32 = arith.constant 4 : i32
    %39 = tpu.dynamic_rotate %0 by %c4_i32 dim 1 : vector<4x256xf32>, i32 -> vector<4x256xf32>
    %c4_i32_9 = arith.constant 4 : i32
    %40 = vector.broadcast %c4_i32_9 : i32 to vector<1x256xi32>
    %41 = arith.cmpi sge, %17, %40 : vector<1x256xi32>
    %cst_10 = arith.constant 0.000000e+00 : f32
    %42 = vector.shape_cast %41 : vector<1x256xi1> to vector<1x256xi1>
    %43 = vector.broadcast %42 : vector<1x256xi1> to vector<4x256xi1>
    %44 = vector.broadcast %cst_10 : f32 to vector<4x256xf32>
    %45 = arith.select %43, %39, %44 : vector<4x256xi1>, vector<4x256xf32>
    %c3_i32 = arith.constant 3 : i32
    %46 = tpu.dynamic_rotate %0 by %c3_i32 dim 1 : vector<4x256xf32>, i32 -> vector<4x256xf32>
    %c3_i32_11 = arith.constant 3 : i32
    %47 = vector.broadcast %c3_i32_11 : i32 to vector<1x256xi32>
    %48 = arith.cmpi sge, %17, %47 : vector<1x256xi32>
    %cst_12 = arith.constant 0.000000e+00 : f32
    %49 = vector.shape_cast %48 : vector<1x256xi1> to vector<1x256xi1>
    %50 = vector.broadcast %49 : vector<1x256xi1> to vector<4x256xi1>
    %51 = vector.broadcast %cst_12 : f32 to vector<4x256xf32>
    %52 = arith.select %50, %46, %51 : vector<4x256xi1>, vector<4x256xf32>
    %c2_i32 = arith.constant 2 : i32
    %53 = tpu.dynamic_rotate %0 by %c2_i32 dim 1 : vector<4x256xf32>, i32 -> vector<4x256xf32>
    %c2_i32_13 = arith.constant 2 : i32
    %54 = vector.broadcast %c2_i32_13 : i32 to vector<1x256xi32>
    %55 = arith.cmpi sge, %17, %54 : vector<1x256xi32>
    %cst_14 = arith.constant 0.000000e+00 : f32
    %56 = vector.shape_cast %55 : vector<1x256xi1> to vector<1x256xi1>
    %57 = vector.broadcast %56 : vector<1x256xi1> to vector<4x256xi1>
    %58 = vector.broadcast %cst_14 : f32 to vector<4x256xf32>
    %59 = arith.select %57, %53, %58 : vector<4x256xi1>, vector<4x256xf32>
    %c1_i32_15 = arith.constant 1 : i32
    %60 = tpu.dynamic_rotate %0 by %c1_i32_15 dim 1 : vector<4x256xf32>, i32 -> vector<4x256xf32>
    %c1_i32_16 = arith.constant 1 : i32
    %61 = vector.broadcast %c1_i32_16 : i32 to vector<1x256xi32>
    %62 = arith.cmpi sge, %17, %61 : vector<1x256xi32>
    %cst_17 = arith.constant 0.000000e+00 : f32
    %63 = vector.shape_cast %62 : vector<1x256xi1> to vector<1x256xi1>
    %64 = vector.broadcast %63 : vector<1x256xi1> to vector<4x256xi1>
    %65 = vector.broadcast %cst_17 : f32 to vector<4x256xf32>
    %66 = arith.select %64, %60, %65 : vector<4x256xi1>, vector<4x256xf32>
    %c255_i32 = arith.constant 255 : i32
    %67 = tpu.dynamic_rotate %0 by %c255_i32 dim 1 : vector<4x256xf32>, i32 -> vector<4x256xf32>
    %c127_i32 = arith.constant 127 : i32
    %68 = vector.broadcast %c127_i32 : i32 to vector<1x256xi32>
    %69 = arith.cmpi slt, %17, %68 : vector<1x256xi32>
    %cst_18 = arith.constant 0.000000e+00 : f32
    %70 = vector.shape_cast %69 : vector<1x256xi1> to vector<1x256xi1>
    %71 = vector.broadcast %70 : vector<1x256xi1> to vector<4x256xi1>
    %72 = vector.broadcast %cst_18 : f32 to vector<4x256xf32>
    %73 = arith.select %71, %67, %72 : vector<4x256xi1>, vector<4x256xf32>
    %c254_i32 = arith.constant 254 : i32
    %74 = tpu.dynamic_rotate %0 by %c254_i32 dim 1 : vector<4x256xf32>, i32 -> vector<4x256xf32>
    %c126_i32 = arith.constant 126 : i32
    %75 = vector.broadcast %c126_i32 : i32 to vector<1x256xi32>
    %76 = arith.cmpi slt, %17, %75 : vector<1x256xi32>
    %cst_19 = arith.constant 0.000000e+00 : f32
    %77 = vector.shape_cast %76 : vector<1x256xi1> to vector<1x256xi1>
    %78 = vector.broadcast %77 : vector<1x256xi1> to vector<4x256xi1>
    %79 = vector.broadcast %cst_19 : f32 to vector<4x256xf32>
    %80 = arith.select %78, %74, %79 : vector<4x256xi1>, vector<4x256xf32>
    %c253_i32 = arith.constant 253 : i32
    %81 = tpu.dynamic_rotate %0 by %c253_i32 dim 1 : vector<4x256xf32>, i32 -> vector<4x256xf32>
    %c125_i32 = arith.constant 125 : i32
    %82 = vector.broadcast %c125_i32 : i32 to vector<1x256xi32>
    %83 = arith.cmpi slt, %17, %82 : vector<1x256xi32>
    %cst_20 = arith.constant 0.000000e+00 : f32
    %84 = vector.shape_cast %83 : vector<1x256xi1> to vector<1x256xi1>
    %85 = vector.broadcast %84 : vector<1x256xi1> to vector<4x256xi1>
    %86 = vector.broadcast %cst_20 : f32 to vector<4x256xf32>
    %87 = arith.select %85, %81, %86 : vector<4x256xi1>, vector<4x256xf32>
    %c252_i32 = arith.constant 252 : i32
    %88 = tpu.dynamic_rotate %0 by %c252_i32 dim 1 : vector<4x256xf32>, i32 -> vector<4x256xf32>
    %c124_i32 = arith.constant 124 : i32
    %89 = vector.broadcast %c124_i32 : i32 to vector<1x256xi32>
    %90 = arith.cmpi slt, %17, %89 : vector<1x256xi32>
    %cst_21 = arith.constant 0.000000e+00 : f32
    %91 = vector.shape_cast %90 : vector<1x256xi1> to vector<1x256xi1>
    %92 = vector.broadcast %91 : vector<1x256xi1> to vector<4x256xi1>
    %93 = vector.broadcast %cst_21 : f32 to vector<4x256xf32>
    %94 = arith.select %92, %88, %93 : vector<4x256xi1>, vector<4x256xf32>
    %c251_i32 = arith.constant 251 : i32
    %95 = tpu.dynamic_rotate %0 by %c251_i32 dim 1 : vector<4x256xf32>, i32 -> vector<4x256xf32>
    %c123_i32 = arith.constant 123 : i32
    %96 = vector.broadcast %c123_i32 : i32 to vector<1x256xi32>
    %97 = arith.cmpi slt, %17, %96 : vector<1x256xi32>
    %cst_22 = arith.constant 0.000000e+00 : f32
    %98 = vector.shape_cast %97 : vector<1x256xi1> to vector<1x256xi1>
    %99 = vector.broadcast %98 : vector<1x256xi1> to vector<4x256xi1>
    %100 = vector.broadcast %cst_22 : f32 to vector<4x256xf32>
    %101 = arith.select %99, %95, %100 : vector<4x256xi1>, vector<4x256xf32>
    %c250_i32 = arith.constant 250 : i32
    %102 = tpu.dynamic_rotate %0 by %c250_i32 dim 1 : vector<4x256xf32>, i32 -> vector<4x256xf32>
    %c122_i32 = arith.constant 122 : i32
    %103 = vector.broadcast %c122_i32 : i32 to vector<1x256xi32>
    %104 = arith.cmpi slt, %17, %103 : vector<1x256xi32>
    %cst_23 = arith.constant 0.000000e+00 : f32
    %105 = vector.shape_cast %104 : vector<1x256xi1> to vector<1x256xi1>
    %106 = vector.broadcast %105 : vector<1x256xi1> to vector<4x256xi1>
    %107 = vector.broadcast %cst_23 : f32 to vector<4x256xf32>
    %108 = arith.select %106, %102, %107 : vector<4x256xi1>, vector<4x256xf32>
    %c249_i32 = arith.constant 249 : i32
    %109 = tpu.dynamic_rotate %0 by %c249_i32 dim 1 : vector<4x256xf32>, i32 -> vector<4x256xf32>
    %c121_i32 = arith.constant 121 : i32
    %110 = vector.broadcast %c121_i32 : i32 to vector<1x256xi32>
    %111 = arith.cmpi slt, %17, %110 : vector<1x256xi32>
    %cst_24 = arith.constant 0.000000e+00 : f32
    %112 = vector.shape_cast %111 : vector<1x256xi1> to vector<1x256xi1>
    %113 = vector.broadcast %112 : vector<1x256xi1> to vector<4x256xi1>
    %114 = vector.broadcast %cst_24 : f32 to vector<4x256xf32>
    %115 = arith.select %113, %109, %114 : vector<4x256xi1>, vector<4x256xf32>
    %116 = tpu.concatenate %24, %31, %38, %45, %52, %59, %66, %0, %73, %80, %87, %94, %101, %108, %115 in 0 : vector<4x256xf32>, vector<4x256xf32>, vector<4x256xf32>, vector<4x256xf32>, vector<4x256xf32>, vector<4x256xf32>, vector<4x256xf32>, vector<4x256xf32>, vector<4x256xf32>, vector<4x256xf32>, vector<4x256xf32>, vector<4x256xf32>, vector<4x256xf32>, vector<4x256xf32>, vector<4x256xf32> -> vector<60x256xf32>
    %c0_25 = arith.constant 0 : index
    %c0_26 = arith.constant 0 : index
    %117 = vector.load %arg2[%c0_25, %c0_26] : memref<8x60xf32, #tpu.memory_space<vmem>>, vector<8x60xf32>
    %cst_27 = arith.constant dense<0.000000e+00> : vector<8x256xf32>
    %118 = tpu.matmul %117, %116, %cst_27 {dimension_numbers = #tpu.dot_dimension_numbers<[1], [0], [0], [1], [0, 0, 1, 1], [], []>} : vector<8x60xf32>, vector<60x256xf32>, vector<8x256xf32> -> vector<8x256xf32>
    %cst_28 = arith.constant dense<0.000000e+00> : vector<8xf32>
    %119 = vector.multi_reduction <add>, %118, %cst_28 [1] : vector<8x256xf32> to vector<8xf32>
    %120 = vector.shape_cast %119 : vector<8xf32> to vector<8x1xf32>
    %cst_29 = arith.constant 2.560000e+02 : f32
    %121 = vector.broadcast %cst_29 : f32 to vector<8x1xf32>
    %122 = arith.divf %120, %121 : vector<8x1xf32>
    %123 = vector.broadcast %122 : vector<8x1xf32> to vector<8x256xf32>
    %124 = arith.subf %118, %123 : vector<8x256xf32>
    %125 = arith.mulf %124, %124 : vector<8x256xf32>
    %cst_30 = arith.constant dense<0.000000e+00> : vector<8xf32>
    %126 = vector.multi_reduction <add>, %125, %cst_30 [1] : vector<8x256xf32> to vector<8xf32>
    %127 = vector.shape_cast %126 : vector<8xf32> to vector<8x1xf32>
    %cst_31 = arith.constant 2.560000e+02 : f32
    %128 = vector.broadcast %cst_31 : f32 to vector<8x1xf32>
    %129 = arith.divf %127, %128 : vector<8x1xf32>
    %cst_32 = arith.constant 9.99999974E-6 : f32
    %130 = vector.broadcast %cst_32 : f32 to vector<8x1xf32>
    %131 = arith.addf %129, %130 : vector<8x1xf32>
    %132 = math.rsqrt %131 : vector<8x1xf32>
    %c0_33 = arith.constant 0 : index
    %c0_34 = arith.constant 0 : index
    %c0_35 = arith.constant 0 : index
    %133 = vector.load %arg3[%c0_33, %c0_34, %c0_35] : memref<2x8x1xf32, #tpu.memory_space<vmem>>, vector<1x8x1xf32>
    %134 = vector.shape_cast %133 : vector<1x8x1xf32> to vector<8x1xf32>
    %c1 = arith.constant 1 : index
    %c0_36 = arith.constant 0 : index
    %c0_37 = arith.constant 0 : index
    %135 = vector.load %arg3[%c1, %c0_36, %c0_37] : memref<2x8x1xf32, #tpu.memory_space<vmem>>, vector<1x8x1xf32>
    %136 = vector.shape_cast %135 : vector<1x8x1xf32> to vector<8x1xf32>
    %137 = arith.mulf %132, %134 : vector<8x1xf32>
    %138 = vector.broadcast %137 : vector<8x1xf32> to vector<8x256xf32>
    %139 = arith.mulf %124, %138 : vector<8x256xf32>
    %140 = vector.broadcast %136 : vector<8x1xf32> to vector<8x256xf32>
    %141 = arith.addf %139, %140 : vector<8x256xf32>
    %cst_38 = arith.constant 0.000000e+00 : f32
    %142 = vector.broadcast %cst_38 : f32 to vector<8x256xf32>
    %143 = arith.cmpf oge, %141, %142 : vector<8x256xf32>
    %cst_39 = arith.constant 1.000000e-01 : f32
    %144 = vector.broadcast %cst_39 : f32 to vector<8x256xf32>
    %145 = arith.mulf %144, %141 : vector<8x256xf32>
    %146 = arith.select %143, %141, %145 : vector<8x256xi1>, vector<8x256xf32>
    %c0_40 = arith.constant 0 : index
    %c0_41 = arith.constant 0 : index
    %147 = vector.load %arg4[%c0_40, %c0_41] : memref<8x256xf32, #tpu.memory_space<vmem>>, vector<8x256xf32>
    tpu.vector_store %arg4[%c0_40, %c0_41], %146 {strides = array<i32>} : memref<8x256xf32, #tpu.memory_space<vmem>>, vector<8x256xf32>,
    return
  }
  func.func @transform_0(%arg0: i32) -> (i32, i32) {
    %c0_i32 = arith.constant 0 : i32
    %c0_i32_0 = arith.constant 0 : i32
    %c0_i32_1 = arith.constant 0 : i32
    return %c0_i32, %c0_i32_0 : i32, i32
  }
  func.func @transform_1(%arg0: i32) -> (i32, i32) {
    %c0_i32 = arith.constant 0 : i32
    %c0_i32_0 = arith.constant 0 : i32
    %c0_i32_1 = arith.constant 0 : i32
    return %c0_i32, %c0_i32_0 : i32, i32
  }
  func.func @transform_2(%arg0: i32) -> (i32, i32, i32) {
    %c0_i32 = arith.constant 0 : i32
    %c0_i32_0 = arith.constant 0 : i32
    %c0_i32_1 = arith.constant 0 : i32
    %c0_i32_2 = arith.constant 0 : i32
    return %c0_i32, %c0_i32_0, %c0_i32_1 : i32, i32, i32
  }
  func.func @transform_3(%arg0: i32) -> (i32, i32) {
    %c0_i32 = arith.constant 0 : i32
    %c0_i32_0 = arith.constant 0 : i32
    %c0_i32_1 = arith.constant 0 : i32
    return %c0_i32, %c0_i32_0 : i32, i32
  }
}

</mosaic_0001>

<bundles_post_ra>
// kernel: tpu_custom_call.1
= control target key start
LH: loop header
LB: loop body
LE: loop exit
PB: predicated region body
PF: predicated region fallthrough
CT: control target
= control target key end

     0   :  { %s648_s0 = inlined_call_operand.vmem [shape: f32[4,256], index: 0, kind: input, shape index: {}]   ;;  %s649_s1 = inlined_call_operand.vmem [shape: f32[8,60], index: 1, kind: input, shape index: {}]   ;;  %s650_s2 = inlined_call_operand.vmem [shape: f32[2,8,1], index: 2, kind: input, shape index: {}]   ;;  %s651_s3 = inlined_call_operand.hbm [shape: f32[8,256], index: 3, kind: output, shape index: {}]  }
   0x1   :  { %v535_v0 = vld [vmem:[%s648_s0] sm:$0xff] }
   0x2   :  { %8 = vsyncpa [#allocation3], 0  ;;  %s495_s14 = smov 121   ;;  %s496_s15 = smov 122   ;;  %v44_v1 = vcombine.high %v535_v0, %v535_v0  ;;  %v506_v2 = vmov 0.0   ;;  %v16_v3 = vlaneseq  ;;  %vm294_vm3 = vcmask 1043456  }
   0x3   :  { %241 = vrot.lane.b32.xlu1 %v535_v0, %s495_s14  ;;  %226 = vrot.lane.b32.xlu0 %v535_v0, %s496_s15  ;;  %s497_s16 = smov 124   ;;  %s498_s17 = smov 123   ;;  %v274_v63 = vcombine.low %v535_v0, %v535_v0 }
   0x4   :  { %s499_s0 = smov 126   ;;  %s500_s18 = smov 125   ;;  %384 = vmatprep.mubr.f32.mxu0 %v506_v2  ;;  %v553_v4 = vand.u32 127, %v16_v3 }
   0x5   :  { %s501_s19 = smov 127   ;;  %s502_s20 = smov 2  }
   0x6   :  { %s503_s21 = smov 1   ;;  %s504_s22 = smov 4   ;;  %v18_v5 = vadd.s32 128, %v553_v4  ;;  %vm245_vm0 = vcmp.lt.s32.totalorder %v553_v4, 121  ;;  %vm230_vm2 = vcmp.lt.s32.totalorder %v553_v4, 122  ;;  %vm215_vm5 = vcmp.lt.s32.totalorder %v553_v4, 123 }
   0x7   :  { %243 = vrot.lane.b32.xlu1 %v44_v1, %s495_s14  ;;  %228 = vrot.lane.b32.xlu0 %v44_v1, %s496_s15  ;;  %s505_s23 = smov 3   ;;  %s507_s24 = smov 6   ;;  %vm200_vm7 = vcmp.lt.s32.totalorder %v553_v4, 124  ;;  %vm170_vm9 = vcmp.lt.s32.totalorder %v553_v4, 126  ;;  %vm185_vm10 = vcmp.lt.s32.totalorder %v553_v4, 125  ;;  %vm155_vm13 = vcmp.lt.s32.totalorder %v553_v4, 127 }
   0x8   :  { %s508_s25 = smov 5   ;;  %s509_s26 = smov 7   ;;  %v556_v6 = vand.u32 127, %v18_v5  ;;  %vm140_vm15 = vcmp.lt.s32.totalorder %v553_v4, 1 }
   0x9   :  { %s511_s5 = smov [#allocation2]  }
   0xa   :  { %vm249_vm1 = vcmp.lt.s32.totalorder %v556_v6, 121  ;;  %vm234_vm4 = vcmp.lt.s32.totalorder %v556_v6, 122  ;;  %vm219_vm6 = vcmp.lt.s32.totalorder %v556_v6, 123  ;;  %vm204_vm8 = vcmp.lt.s32.totalorder %v556_v6, 124  ;;  %s438_s6 = sshll.u32 %s511_s5, 4  ;;  %s439_s6 = int_to_ptr.vmem [resolvable:$true] %s438_s6 }
   0xb   :  { %198 = vrot.lane.b32.xlu1 %v44_v1, %s497_s16  ;;  %196 = vrot.lane.b32.xlu0 %v535_v0, %s497_s16  ;;  %vm174_vm11 = vcmp.lt.s32.totalorder %v556_v6, 126  ;;  %vm189_vm12 = vcmp.lt.s32.totalorder %v556_v6, 125  ;;  %vm159_vm14 = vcmp.lt.s32.totalorder %v556_v6, 127  ;;  %p478_p1 = scmp.lt.s32.totalorder %s439_s6, %s439_s6 }
   0xf   :  { %213 = vrot.lane.b32.xlu1 %v44_v1, %s498_s17  ;;  %211 = vrot.lane.b32.xlu0 %v535_v0, %s498_s17 }
  0x13   :  { %168 = vrot.lane.b32.xlu1 %v44_v1, %s499_s0  ;;  %166 = vrot.lane.b32.xlu0 %v535_v0, %s499_s0 }
  0x17   :  { %183 = vrot.lane.b32.xlu1 %v44_v1, %s500_s18  ;;  %181 = vrot.lane.b32.xlu0 %v535_v0, %s500_s18 }
  0x1b   :  { %153 = vrot.lane.b32.xlu1 %v44_v1, %s501_s19  ;;  %151 = vrot.lane.b32.xlu0 %v535_v0, %s501_s19 }
  0x1f   :  { %123 = vrot.lane.b32.xlu1 %v44_v1, %s502_s20  ;;  %121 = vrot.lane.b32.xlu0 %v535_v0, %s502_s20 }
  0x23   :  { %138 = vrot.lane.b32.xlu1 %v44_v1, %s503_s21  ;;  %136 = vrot.lane.b32.xlu0 %v535_v0, %s503_s21 }
  0x27   :  { %93 = vrot.lane.b32.xlu1 %v44_v1, %s504_s22  ;;  %91 = vrot.lane.b32.xlu0 %v535_v0, %s504_s22 }
  0x2b   :  { %108 = vrot.lane.b32.xlu1 %v44_v1, %s505_s23  ;;  %106 = vrot.lane.b32.xlu0 %v535_v0, %s505_s23 }
  0x2f   :  { %63 = vrot.lane.b32.xlu1 %v44_v1, %s507_s24  ;;  %61 = vrot.lane.b32.xlu0 %v535_v0, %s507_s24 }
  0x33   :  { %78 = vrot.lane.b32.xlu1 %v44_v1, %s508_s25  ;;  %76 = vrot.lane.b32.xlu0 %v535_v0, %s508_s25 }
  0x37   :  { %48 = vrot.lane.b32.xlu1 %v44_v1, %s509_s26  ;;  %46 = vrot.lane.b32.xlu0 %v535_v0, %s509_s26 }
  0x75   :  { %v242_v7 = vpop.permute.xlu1 %241  ;;  %v227_v8 = vpop.permute.xlu0 %226 }
  0x79   :  { %v244_v9 = vpop.permute.xlu1 %243  ;;  %v229_v10 = vpop.permute.xlu0 %228 }
  0x7a   :  { %v246_v11 = vsel %vm245_vm0, %v242_v7, %v244_v9  ;;  %v247_v12 = vsel %vm245_vm0, %v244_v9, %v242_v7  ;;  %v231_v15 = vsel %vm230_vm2, %v227_v8, %v229_v10  ;;  %v232_v16 = vsel %vm230_vm2, %v229_v10, %v227_v8 }
  0x7b   :  { %v255_v13 = vsel %vm249_vm1, %v247_v12, 0.0  ;;  %v254_v14 = vsel %vm245_vm0, %v246_v11, 0.0  ;;  %v239_v19 = vsel %vm230_vm2, %v231_v15, 0.0  ;;  %v240_v20 = vsel %vm234_vm4, %v232_v16, 0.0 }
  0x7c   :  { %446 = vmatprep.subr.msk.mxu0 %vm294_vm3, %v255_v13  ;;  %v290_v23 = vrot.slane %v239_v19, 4  ;;  %v291_v24 = vrot.slane %v240_v20, 4  ;;  %vm143_vm0 = vcmp.ge.s32.totalorder %v553_v4, 1  ;;  %vm144_vm1 = vcmp.ge.s32.totalorder %v556_v6, 1 }
  0x7d   :  { %447 = vmatpush1.msk.msra.mxu0 %vm294_vm3, %v254_v14  ;;  %v199_v17 = vpop.permute.xlu1 %198  ;;  %v197_v18 = vpop.permute.xlu0 %196  ;;  %vm125_vm2 = vcmp.lt.s32.totalorder %v553_v4, 2  ;;  %vm128_vm4 = vcmp.ge.s32.totalorder %v553_v4, 2 }
  0x7e   :  { %v201_v29 = vsel %vm200_vm7, %v197_v18, %v199_v17  ;;  %v202_v30 = vsel %vm200_vm7, %v199_v17, %v197_v18 }
  0x7f   :  { %v209_v35 = vsel %vm200_vm7, %v201_v29, 0.0  ;;  %v210_v36 = vsel %vm204_vm8, %v202_v30, 0.0  ;;  %vm113_vm7 = vcmp.ge.s32.totalorder %v553_v4, 3  ;;  %vm114_vm8 = vcmp.ge.s32.totalorder %v556_v6, 3 }
  0x80   :  { %v284_v41 = vrot.slane %v209_v35, 4  ;;  %v285_v42 = vrot.slane %v210_v36, 4 }
  0x81   :  { %v214_v21 = vpop.permute.xlu1 %213  ;;  %v212_v22 = vpop.permute.xlu0 %211 }
  0x82   :  { %v216_v25 = vsel %vm215_vm5, %v212_v22, %v214_v21  ;;  %v217_v26 = vsel %vm215_vm5, %v214_v21, %v212_v22 }
  0x83   :  { %v224_v27 = vsel %vm215_vm5, %v216_v25, 0.0  ;;  %v225_v28 = vsel %vm219_vm6, %v217_v26, 0.0  ;;  %vm129_vm5 = vcmp.ge.s32.totalorder %v556_v6, 2  ;;  %vm110_vm6 = vcmp.lt.s32.totalorder %v553_v4, 3 }
  0x84   :  { %v308_v31 = vsel %vm294_vm3, %v225_v28, %v291_v24  ;;  %v307_v32 = vsel %vm294_vm3, %v224_v27, %v290_v23 }
  0x85   :  { %v169_v33 = vpop.permute.xlu1 %168  ;;  %338 = vmatprep.subr.mxu0 %v308_v31  ;;  %v167_v34 = vpop.permute.xlu0 %166 }
  0x86   :  { %339 = vmatpush1.msra.mxu0 %v307_v32  ;;  %v171_v37 = vsel %vm170_vm9, %v167_v34, %v169_v33  ;;  %v172_v38 = vsel %vm170_vm9, %v169_v33, %v167_v34 }
  0x87   :  { %v179_v45 = vsel %vm170_vm9, %v171_v37, 0.0  ;;  %v180_v46 = vsel %vm174_vm11, %v172_v38, 0.0  ;;  %vm95_vm9 = vcmp.lt.s32.totalorder %v553_v4, 4  ;;  %vm99_vm11 = vcmp.ge.s32.totalorder %v556_v6, 4 }
  0x88   :  { %v278_v53 = vrot.slane %v179_v45, 4  ;;  %v279_v54 = vrot.slane %v180_v46, 4 }
  0x89   :  { %v184_v39 = vpop.permute.xlu1 %183  ;;  %v182_v40 = vpop.permute.xlu0 %181 }
  0x8a   :  { %v186_v43 = vsel %vm185_vm10, %v182_v40, %v184_v39  ;;  %v187_v44 = vsel %vm185_vm10, %v184_v39, %v182_v40 }
  0x8b   :  { %v194_v47 = vsel %vm185_vm10, %v186_v43, 0.0  ;;  %v195_v48 = vsel %vm189_vm12, %v187_v44, 0.0  ;;  %vm98_vm10 = vcmp.ge.s32.totalorder %v553_v4, 4  ;;  %vm65_vm12 = vcmp.lt.s32.totalorder %v553_v4, 6 }
  0x8c   :  { %v306_v49 = vsel %vm294_vm3, %v195_v48, %v285_v42  ;;  %v305_v50 = vsel %vm294_vm3, %v194_v47, %v284_v41 }
  0x8d   :  { %v154_v51 = vpop.permute.xlu1 %153  ;;  %340 = vmatprep.subr.mxu0 %v306_v49  ;;  %v152_v52 = vpop.permute.xlu0 %151 }
  0x8e   :  { %v156_v55 = vsel %vm155_vm13, %v152_v52, %v154_v51  ;;  %v157_v56 = vsel %vm155_vm13, %v154_v51, %v152_v52  ;;  %341 = vmatpush1.msra.mxu0 %v305_v50 }
  0x8f   :  { %v164_v57 = vsel %vm155_vm13, %v156_v55, 0.0  ;;  %v165_v58 = vsel %vm159_vm14, %v157_v56, 0.0  ;;  %vm68_vm13 = vcmp.ge.s32.totalorder %v553_v4, 6  ;;  %vm69_vm14 = vcmp.ge.s32.totalorder %v556_v6, 6  ;;  %v309_v55 = vld [vmem:[%s649_s1] sm:$0xff] }
  0x90   :  { %v304_v59 = vsel %vm294_vm3, %v165_v58, %v279_v54  ;;  %v303_v60 = vsel %vm294_vm3, %v164_v57, %v278_v53 }
  0x91   :  { %v124_v61 = vpop.permute.xlu1 %123  ;;  %342 = vmatprep.subr.mxu0 %v304_v59  ;;  %v122_v62 = vpop.permute.xlu0 %121 }
  0x92   :  { %343 = vmatpush1.msra.mxu0 %v303_v60  ;;  %v126_v9 = vsel %vm125_vm2, %v122_v62, %v124_v61  ;;  %v127_v10 = vsel %vm125_vm2, %v124_v61, %v122_v62  ;;  %vm50_vm2 = vcmp.lt.s32.totalorder %v553_v4, 7 }
  0x93   :  { %v134_v15 = vsel %vm128_vm4, %v127_v10, 0.0  ;;  %v135_v16 = vsel %vm129_vm5, %v126_v9, 0.0  ;;  %vm53_vm4 = vcmp.ge.s32.totalorder %v553_v4, 7  ;;  %vm54_vm5 = vcmp.ge.s32.totalorder %v556_v6, 7  ;;  %v406_v9 = vld [vmem:[%s650_s2] sm:$0xff] }
  0x94   :  { %v270_v19 = vrot.slane %v134_v15, 4 }
  0x95   :  { %v139_v1 = vpop.permute.xlu1 %138  ;;  %v137_v2 = vpop.permute.xlu0 %136 }
  0x96   :  { %v141_v3 = vsel %vm140_vm15, %v137_v2, %v139_v1  ;;  %v142_v5 = vsel %vm140_vm15, %v139_v1, %v137_v2  ;;  %vm80_vm15 = vcmp.lt.s32.totalorder %v553_v4, 5  ;;  %v510_v2 = vmov 0  }
  0x97   :  { %v149_v7 = vsel %vm143_vm0, %v142_v5, 0.0  ;;  %v150_v8 = vsel %vm144_vm1, %v141_v3, 0.0  ;;  %vm83_vm0 = vcmp.ge.s32.totalorder %v553_v4, 5  ;;  %vm84_vm1 = vcmp.ge.s32.totalorder %v556_v6, 5  ;;  %467 = vset.pattern.permute.xlu0 %v510_v2  ;;  %468 = vset.pattern.permute.xlu1 %v510_v2  ;;  %v449_v3 = vld [vmem:[%s650_s2 + $0x8] sm:$0xff]  ;;  %s473_s2 = scalar_lea.vmem %s439_s6, 256 }
  0x98   :  { %v302_v11 = vsel %vm294_vm3, %v150_v8, %v535_v0  ;;  %v301_v12 = vsel %vm294_vm3, %v149_v7, %v274_v63  ;;  %v271_v0 = vrot.slane %v135_v16, 4  ;;  %p474_p0 = scmp.ne.s32.totalorder %s439_s6, %s473_s2  ;;  %p479_p2 = scmp.lt.s32.totalorder %s473_s2, %s473_s2 }
  0x99   :  { %v94_v13 = vpop.permute.xlu1 %93  ;;  %344 = vmatprep.subr.mxu0 %v302_v11  ;;  %v92_v14 = vpop.permute.xlu0 %91 }
  0x9a   :  { %345 = vmatpush1.msra.mxu0 %v301_v12  ;;  %v96_v24 = vsel %vm95_vm9, %v92_v14, %v94_v13  ;;  %v97_v25 = vsel %vm95_vm9, %v94_v13, %v92_v14  ;;  %p480_p3 = por %p479_p2, %p478_p1 }
  0x9b   :  { %v104_v30 = vsel %vm98_vm10, %v97_v25, 0.0  ;;  %v105_v31 = vsel %vm99_vm11, %v96_v24, 0.0 }
  0x9c   :  { %v264_v36 = vrot.slane %v104_v30, 4  ;;  %v265_v37 = vrot.slane %v105_v31, 4  ;;  %p481_p4 = pnand %p480_p3, %p474_p0 }
  0x9d   :  { %v109_v17 = vpop.permute.xlu1 %108  ;;  %v107_v18 = vpop.permute.xlu0 %106 }
  0x9e   :  { %v111_v20 = vsel %vm110_vm6, %v107_v18, %v109_v17  ;;  %v112_v21 = vsel %vm110_vm6, %v109_v17, %v107_v18  ;;  %vm310_vm6 = vcmask 490496  }
  0x9f   :  { %v119_v22 = vsel %vm113_vm7, %v112_v21, 0.0  ;;  %v120_v23 = vsel %vm114_vm8, %v111_v20, 0.0 }
  0xa0   :  { %v300_v26 = vsel %vm294_vm3, %v120_v23, %v271_v0  ;;  %v299_v27 = vsel %vm294_vm3, %v119_v22, %v270_v19 }
  0xa1   :  { %v64_v28 = vpop.permute.xlu1 %63  ;;  %346 = vmatprep.subr.mxu0 %v300_v26  ;;  %v62_v29 = vpop.permute.xlu0 %61 }
  0xa2   :  { %347 = vmatpush1.msra.mxu0 %v299_v27  ;;  %v66_v32 = vsel %vm65_vm12, %v62_v29, %v64_v28  ;;  %v67_v33 = vsel %vm65_vm12, %v64_v28, %v62_v29 }
  0xa3   :  { %v74_v40 = vsel %vm68_vm13, %v67_v33, 0.0  ;;  %v75_v41 = vsel %vm69_vm14, %v66_v32, 0.0 }
  0xa4   :  { %v258_v48 = vrot.slane %v74_v40, 4  ;;  %v259_v49 = vrot.slane %v75_v41, 4 }
  0xa5   :  { %v79_v34 = vpop.permute.xlu1 %78  ;;  %v77_v35 = vpop.permute.xlu0 %76 }
  0xa6   :  { %v81_v38 = vsel %vm80_vm15, %v77_v35, %v79_v34  ;;  %v82_v39 = vsel %vm80_vm15, %v79_v34, %v77_v35 }
  0xa7   :  { %v89_v42 = vsel %vm83_vm0, %v82_v39, 0.0  ;;  %v90_v43 = vsel %vm84_vm1, %v81_v38, 0.0 }
  0xa8   :  { %v298_v44 = vsel %vm294_vm3, %v90_v43, %v265_v37  ;;  %v297_v45 = vsel %vm294_vm3, %v89_v42, %v264_v36 }
  0xa9   :  { %v49_v46 = vpop.permute.xlu1 %48  ;;  %348 = vmatprep.subr.mxu0 %v298_v44  ;;  %v47_v47 = vpop.permute.xlu0 %46 }
  0xaa   :  { %v51_v50 = vsel %vm50_vm2, %v47_v47, %v49_v46  ;;  %v52_v51 = vsel %vm50_vm2, %v49_v46, %v47_v47  ;;  %349 = vmatpush1.msra.mxu0 %v297_v45 }
  0xab   :  { %v59_v52 = vsel %vm53_vm4, %v52_v51, 0.0  ;;  %v60_v53 = vsel %vm54_vm5, %v51_v50, 0.0 }
  0xac   :  { %v296_v54 = vsel %vm294_vm3, %v60_v53, %v259_v49  ;;  %v295_v6 = vsel %vm294_vm3, %v59_v52, %v258_v48 }
  0xad   :  { %350 = vmatprep.subr.mxu0 %v296_v54 }
  0xae   :  { %351 = vmatpush1.msra.mxu0 %v295_v6 }
  0xaf   :  { %448 = vmatmul.mubr.msk.f32.vlgmr.msra.gmra.mxu0 %vm310_vm6, %v309_v55 }
 0x16f   :  { %v386_v56 = vpop.f32.mrf.mxu0 }
 0x171   :  { %v388_v57 = vpop.f32.mrf.mxu0 }
 0x172   :  { %v391_v58 = vadd.f32 %v388_v57, %v386_v56 }
 0x174   :  { %392 = vadd.xlane.f32.xlu0 %v391_v58 }
 0x1fd   :  { %v393_v4 = vpop.xlane.xlu0 %392 }
 0x1fe   :  { %v395_v59 = vmul.f32 0.00390625, %v393_v4 }
 0x200   :  { %v396_v60 = vsub.f32 %v386_v56, %v395_v59  ;;  %v397_v61 = vsub.f32 %v388_v57, %v395_v59 }
 0x202   :  { %v398_v62 = vmul.f32 %v396_v60, %v396_v60  ;;  %v399_v63 = vmul.f32 %v397_v61, %v397_v61 }
 0x204   :  { %v400_v1 = vadd.f32 %v399_v63, %v398_v62 }
 0x206   :  { %401 = vadd.xlane.f32.xlu1 %v400_v1 }
 0x217   :  { %419 = vperm.xlu1 %468, %v449_v3  }
 0x28f   :  { %v402_v5 = vpop.xlane.xlu1 %401 }
 0x290   :  { %v403_v7 = vmul.f32 0.00390625, %v402_v5 }
 0x292   :  { %v404_v8 = vadd.f32 1e-05, %v403_v7 }
 0x293   :  { %v420_v13 = vpop.permute.xlu1 %419 }
 0x294   :  { %471 = vrsqrt.f32 %v404_v8 }
 0x2a1   :  { %v472_v10 = vpop.eup %471 }
 0x2a2   :  { %v409_v11 = vmul.f32 %v472_v10, %v406_v9 }
 0x2a4   :  { %412 = vperm.xlu0 %467, %v409_v11  }
 0x31f   :  { %v413_v12 = vpop.permute.xlu0 %412 }
 0x320   :  { %v415_v14 = vmul.f32 %v413_v12, %v396_v60  ;;  %v416_v15 = vmul.f32 %v413_v12, %v397_v61 }
 0x322   :  { %v422_v16 = vadd.f32 %v420_v13, %v415_v14  ;;  %v423_v17 = vadd.f32 %v420_v13, %v416_v15 }
 0x324   :  { %vm424_vm3 = vcmp.ge.f32.partialorder %v422_v16, 0.0  ;;  %vm425_vm7 = vcmp.ge.f32.partialorder %v423_v17, 0.0  ;;  %v426_v18 = vmul.f32 0.1, %v422_v16  ;;  %v427_v19 = vmul.f32 0.1, %v423_v17 }
 0x326   :  { %v428_v0 = vsel %vm424_vm3, %v422_v16, %v426_v18  ;;  %v429_v20 = vsel %vm425_vm7, %v423_v17, %v427_v19 }
 0x327   :  { %430 = vst [vmem:[#allocation2] sm:$0xff] %v428_v0  ;;  %431 = vst [vmem:[#allocation2 + $0x8] sm:$0xff] %v429_v20 }
 0x328   :  { %484 = shalt.err (!%p481_p4)
}
 0x329   :  { %441 = dma.vmem_to_hbm [thread:$0]  %s439_s6, 256, %s651_s3, [#allocation3]  }
 0x32a   :  { %493 = dma.done.wait [#allocation3], 256  }
 0x32b   :  { %494 = vsyncadd [#allocation3], 4294967040 }
 0x32c   :  { %445 = vsyncpa [#allocation3], 1 }

</bundles_post_ra>
